<compile_context>
chip_gen: v7x
topology: tpu7x:2x2x1
jax: 0.10.0
libtpu: 0.0.40
codegen_flags: <defaults>
</compile_context>

<pallas_src>
import functools

import jax
import jax.numpy as jnp
from jax import lax
from jax.experimental import pallas as pl
from jax.experimental.pallas import tpu as pltpu


_VMEM_LIMIT_BYTES = 64 * 1024 * 1024  # safe on v5e/v6e (128 MiB) and v7x (64 MiB)


# --------------------------- QKV projection kernel --------------------------- #
def _qkv_proj_kernel(x_ref, w_ref, q_ref, k_ref, v_ref):
    # x_ref: (1, tr, E) bf16 ; w_ref: (3, E, E) bf16 (scale folded into section 0)
    # q/k/v_ref: (1, tr, E) bf16 outputs.
    x = x_ref[0]
    q_ref[0] = jnp.dot(x, w_ref[0], preferred_element_type=jnp.float32).astype(q_ref.dtype)
    k_ref[0] = jnp.dot(x, w_ref[1], preferred_element_type=jnp.float32).astype(k_ref.dtype)
    v_ref[0] = jnp.dot(x, w_ref[2], preferred_element_type=jnp.float32).astype(v_ref.dtype)


# --------------------------- flash attention kernel --------------------------- #
def _flash_attn_kernel(q_ref, k_ref, v_ref, o_ref,
                       q_scr, k_scr, v_scr, acc_scr, m_scr, l_scr,
                       *, n_heads, head_dim):
    # q_ref : (1, tq,  E) bf16   (scale already folded into the Q weight)
    # k_ref : (1, tkv, E) bf16
    # v_ref : (1, tkv, E) bf16
    # o_ref : (1, tq,  E) lane-dense output block
    # scratch: q_scr (H,tq,D) bf16 ; k_scr/v_scr (H,tkv,D) bf16 (re-staged per step)
    #          acc_scr (H,tq,D) f32 ; m_scr/l_scr (H,tq,1) f32
    j = pl.program_id(2)
    H, D = n_heads, head_dim

    @pl.when(j == 0)
    def _init():
        # Stage Q head-split once per (b, i); Q block is resident across all j.
        for h in range(H):                       # static lane slices, cheap copies
            q_scr[h] = q_ref[0, :, h * D:(h + 1) * D]
        acc_scr[...] = jnp.zeros_like(acc_scr)
        m_scr[...] = jnp.full_like(m_scr, -jnp.inf)
        l_scr[...] = jnp.zeros_like(l_scr)

    # Stage this step's K/V tile head-split (static lane slices -> VMEM copies),
    # so the per-head loop below only needs dynamic *leading-axis* indexing.
    for h in range(H):
        k_scr[h] = k_ref[0, :, h * D:(h + 1) * D]
        v_scr[h] = v_ref[0, :, h * D:(h + 1) * D]

    def head_body(h, carry):
        qh = q_scr[h]                                                    # (tq,  D) bf16
        kh = k_scr[h]                                                    # (tkv, D) bf16
        vh = v_scr[h]                                                    # (tkv, D) bf16

        # q @ k^T without materializing a transpose (contract last dims), f32 acc.
        s = lax.dot_general(qh, kh, (((1,), (1,)), ((), ())),
                            preferred_element_type=jnp.float32)          # (tq, tkv)

        m_prev = m_scr[h]                                                # (tq, 1)
        m_new = jnp.maximum(m_prev, jnp.max(s, axis=-1, keepdims=True))
        alpha = jnp.exp(m_prev - m_new)                                  # (tq, 1)
        p = jnp.exp(s - m_new)                                           # (tq, tkv) f32

        l_scr[h] = alpha * l_scr[h] + jnp.sum(p, axis=-1, keepdims=True)
        acc_scr[h] = alpha * acc_scr[h] + jnp.dot(
            p.astype(jnp.bfloat16), vh, preferred_element_type=jnp.float32)
        m_scr[h] = m_new
        return carry

    # fori_loop (not Python unroll): one head's (tq,tkv) tiles live at a time.
    lax.fori_loop(0, H, head_body, 0)

    @pl.when(j == pl.num_programs(2) - 1)
    def _finalize():
        # Deferred normalization + one lane-dense (tq, E) store.
        heads = []
        for h in range(H):
            inv = pl.reciprocal(l_scr[h], approx=True)                   # EUP
            heads.append((acc_scr[h] * inv).astype(o_ref.dtype))
        o_ref[0] = jnp.concatenate(heads, axis=-1)


# --------------------------------- wrapper --------------------------------- #
def _pick_tile(dim, candidates):
    for c in candidates:
        if dim >= c and dim % c == 0:
            return c
    return dim  # full extent is always a legal block size


def self_attention_forward(x, w_linear, n_heads, *,
                           q_tile=None, kv_tile=None, row_tile=None):
    """x: (B, N, E); w_linear: nn.Linear(E, 3E, bias=False) weight (3E, E)."""
    B, N, E = x.shape
    assert w_linear.shape == (3 * E, E)
    assert E % n_heads == 0
    D = E // n_heads
    scale = 1.0 / float(D) ** 0.5              # PyTorch SDPA default scale

    # One-time weight repack (f32): w3[s] = W[s*E:(s+1)*E, :].T so x @ w3[s] is
    # section s of nn.Linear(x).  Fold 1/sqrt(D) into the Q weight, then bf16.
    w3 = jnp.transpose(w_linear.reshape(3, E, E), (0, 2, 1))
    w3 = w3 * jnp.array([scale, 1.0, 1.0], dtype=w3.dtype).reshape(3, 1, 1)
    w3 = w3.astype(jnp.bfloat16)
    xb = x.astype(jnp.bfloat16)

    # Tile sizes.  v6e: 512-wide kv/row tiles are fine with the raised VMEM
    # limit; on v7x (64 MiB VMEM) shrink kv_tile first if needed.
    tr = row_tile or _pick_tile(N, (512, 256, 128))
    tq = q_tile or _pick_tile(N, (256, 128))
    tkv = kv_tile or _pick_tile(N, (512, 256, 128))
    assert N % tr == 0 and N % tq == 0 and N % tkv == 0

    # ---- stage 1: QKV projection (bf16 operands, f32 accumulate, bf16 out) ----
    qkv_shape = jax.ShapeDtypeStruct((B, N, E), jnp.bfloat16)
    q, k, v = pl.pallas_call(
        _qkv_proj_kernel,
        out_shape=(qkv_shape, qkv_shape, qkv_shape),
        grid_spec=pltpu.PrefetchScalarGridSpec(
            num_scalar_prefetch=0,
            grid=(B, N // tr),
            in_specs=[
                pl.BlockSpec((1, tr, E), lambda b, r: (b, r, 0)),
                pl.BlockSpec((3, E, E), lambda b, r: (0, 0, 0)),
            ],
            out_specs=[
                pl.BlockSpec((1, tr, E), lambda b, r: (b, r, 0)),
                pl.BlockSpec((1, tr, E), lambda b, r: (b, r, 0)),
                pl.BlockSpec((1, tr, E), lambda b, r: (b, r, 0)),
            ],
        ),
        compiler_params=pltpu.CompilerParams(
            dimension_semantics=("parallel", "parallel"),
            vmem_limit_bytes=_VMEM_LIMIT_BYTES),
    )(xb, w3)

    # ---- stage 2: flash attention on the pre-projected bf16 Q/K/V ----
    kern = functools.partial(_flash_attn_kernel, n_heads=n_heads, head_dim=D)
    return pl.pallas_call(
        kern,
        out_shape=jax.ShapeDtypeStruct((B, N, E), x.dtype),
        grid_spec=pltpu.PrefetchScalarGridSpec(
            num_scalar_prefetch=0,
            grid=(B, N // tq, N // tkv),
            in_specs=[
                pl.BlockSpec((1, tq, E), lambda b, i, j: (b, i, 0)),
                pl.BlockSpec((1, tkv, E), lambda b, i, j: (b, j, 0)),
                pl.BlockSpec((1, tkv, E), lambda b, i, j: (b, j, 0)),
            ],
            out_specs=pl.BlockSpec((1, tq, E), lambda b, i, j: (b, i, 0)),
            scratch_shapes=[
                pltpu.VMEM((n_heads, tq, D), jnp.bfloat16),   # Q, head-split
                pltpu.VMEM((n_heads, tkv, D), jnp.bfloat16),  # K tile, head-split
                pltpu.VMEM((n_heads, tkv, D), jnp.bfloat16),  # V tile, head-split
                pltpu.VMEM((n_heads, tq, D), jnp.float32),    # output accumulator
                pltpu.VMEM((n_heads, tq, 1), jnp.float32),    # running max m
                pltpu.VMEM((n_heads, tq, 1), jnp.float32),    # running denom l
            ],
        ),
        compiler_params=pltpu.CompilerParams(
            dimension_semantics=("parallel", "parallel", "arbitrary"),
            vmem_limit_bytes=_VMEM_LIMIT_BYTES),
    )(q, k, v)


# --------------------------- pure-JAX reference --------------------------- #
def reference_forward(x, w_linear, n_heads):
    B, N, E = x.shape
    D = E // n_heads
    qkv = x @ w_linear.T                       # (B, N, 3E), same as nn.Linear
    q, k, v = jnp.split(qkv, 3, axis=2)

    def to_heads(t):
        return jnp.transpose(t.reshape(B, N, n_heads, D), (0, 2, 1, 3))

    qh, kh, vh = to_heads(q), to_heads(k), to_heads(v)
    s = jnp.einsum("bhqd,bhkd->bhqk", qh, kh) / (D ** 0.5)
    p = jax.nn.softmax(s, axis=-1)
    oh = jnp.einsum("bhqk,bhkd->bhqd", p, vh)
    return jnp.transpose(oh, (0, 2, 1, 3)).reshape(B, N, E)


if __name__ == "__main__":
    # Small shapes consistent with the module: batch=2, seq=8, embed_dim=32, n_heads=4.
    B, N, E, H = 2, 8, 32, 4

    key = jax.random.PRNGKey(0)
    kx, kw = jax.random.split(key)
    x = jax.random.normal(kx, (B, N, E), dtype=jnp.float32)
    # nn.Linear(E, 3E, bias=False): weight (3E, E), init U(-1/sqrt(E), 1/sqrt(E)).
    bound = 1.0 / (E ** 0.5)
    w_linear = jax.random.uniform(kw, (3 * E, E), minval=-bound, maxval=bound,
                                  dtype=jnp.float32)

    out = self_attention_forward(x, w_linear, H)
    out = jax.block_until_ready(out)

    ref = reference_forward(x, w_linear, H)
    assert out.shape == (B, N, E)
    # Tolerance covers bf16 MXU operands (f32 accumulation) and the EUP
    # approximate reciprocal used for the deferred softmax normalization.
    assert jnp.allclose(out, ref, atol=3e-2, rtol=3e-2), "mismatch vs reference"

    print("KERNEL_OK")
</pallas_src>

<mosaic_0001>
module attributes {stable_mosaic.version = 11 : i64} {
  func.func @_qkv_proj_kernel(%arg0: i32, %arg1: i32, %arg2: memref<1x8x32xbf16, #tpu.memory_space<vmem>>, %arg3: memref<3x32x32xbf16, #tpu.memory_space<vmem>>, %arg4: memref<1x8x32xbf16, #tpu.memory_space<vmem>>, %arg5: memref<1x8x32xbf16, #tpu.memory_space<vmem>>, %arg6: memref<1x8x32xbf16, #tpu.memory_space<vmem>>) attributes {dimension_semantics = [#tpu.dimension_semantics<parallel>, #tpu.dimension_semantics<parallel>], iteration_bounds = array<i64: 2, 1>, scalar_prefetch = 0 : i64, scratch_operands = 0 : i64, tpu.core_type = #tpu.core_type<tc>, window_params = [{transform_indices = @transform_0, window_bounds = array<i64: 1, 8, 32>}, {pipeline_mode = #tpu.pipeline_mode<synchronous>, transform_indices = @transform_1, window_bounds = array<i64: 3, 32, 32>}, {transform_indices = @transform_2, window_bounds = array<i64: 1, 8, 32>}, {transform_indices = @transform_3, window_bounds = array<i64: 1, 8, 32>}, {transform_indices = @transform_4, window_bounds = array<i64: 1, 8, 32>}]} {
    %c0 = arith.constant 0 : index
    %c0_0 = arith.constant 0 : index
    %c0_1 = arith.constant 0 : index
    %0 = vector.load %arg2[%c0, %c0_0, %c0_1] : memref<1x8x32xbf16, #tpu.memory_space<vmem>>, vector<1x8x32xbf16>
    %1 = vector.shape_cast %0 : vector<1x8x32xbf16> to vector<8x32xbf16>
    %c0_2 = arith.constant 0 : index
    %c0_3 = arith.constant 0 : index
    %c0_4 = arith.constant 0 : index
    %2 = vector.load %arg3[%c0_2, %c0_3, %c0_4] : memref<3x32x32xbf16, #tpu.memory_space<vmem>>, vector<1x32x32xbf16>
    %3 = vector.shape_cast %2 : vector<1x32x32xbf16> to vector<32x32xbf16>
    %cst = arith.constant dense<0.000000e+00> : vector<8x32xf32>
    %4 = tpu.matmul %1, %3, %cst {dimension_numbers = #tpu.dot_dimension_numbers<[1], [0], [0], [1], [0, 0, 1, 1], [], []>} : vector<8x32xbf16>, vector<32x32xbf16>, vector<8x32xf32> -> vector<8x32xf32>
    %5 = arith.truncf %4 : vector<8x32xf32> to vector<8x32xbf16>
    %c0_5 = arith.constant 0 : index
    %c0_6 = arith.constant 0 : index
    %c0_7 = arith.constant 0 : index
    %6 = vector.load %arg4[%c0_5, %c0_6, %c0_7] : memref<1x8x32xbf16, #tpu.memory_space<vmem>>, vector<1x8x32xbf16>
    %7 = vector.shape_cast %6 : vector<1x8x32xbf16> to vector<8x32xbf16>
    %8 = vector.shape_cast %5 : vector<8x32xbf16> to vector<1x8x32xbf16>
    tpu.vector_store %arg4[%c0_5, %c0_6, %c0_7], %8 {strides = array<i32>} : memref<1x8x32xbf16, #tpu.memory_space<vmem>>, vector<1x8x32xbf16>,
    %c1 = arith.constant 1 : index
    %c0_8 = arith.constant 0 : index
    %c0_9 = arith.constant 0 : index
    %9 = vector.load %arg3[%c1, %c0_8, %c0_9] : memref<3x32x32xbf16, #tpu.memory_space<vmem>>, vector<1x32x32xbf16>
    %10 = vector.shape_cast %9 : vector<1x32x32xbf16> to vector<32x32xbf16>
    %cst_10 = arith.constant dense<0.000000e+00> : vector<8x32xf32>
    %11 = tpu.matmul %1, %10, %cst_10 {dimension_numbers = #tpu.dot_dimension_numbers<[1], [0], [0], [1], [0, 0, 1, 1], [], []>} : vector<8x32xbf16>, vector<32x32xbf16>, vector<8x32xf32> -> vector<8x32xf32>
    %12 = arith.truncf %11 : vector<8x32xf32> to vector<8x32xbf16>
    %c0_11 = arith.constant 0 : index
    %c0_12 = arith.constant 0 : index
    %c0_13 = arith.constant 0 : index
    %13 = vector.load %arg5[%c0_11, %c0_12, %c0_13] : memref<1x8x32xbf16, #tpu.memory_space<vmem>>, vector<1x8x32xbf16>
    %14 = vector.shape_cast %13 : vector<1x8x32xbf16> to vector<8x32xbf16>
    %15 = vector.shape_cast %12 : vector<8x32xbf16> to vector<1x8x32xbf16>
    tpu.vector_store %arg5[%c0_11, %c0_12, %c0_13], %15 {strides = array<i32>} : memref<1x8x32xbf16, #tpu.memory_space<vmem>>, vector<1x8x32xbf16>,
    %c2 = arith.constant 2 : index
    %c0_14 = arith.constant 0 : index
    %c0_15 = arith.constant 0 : index
    %16 = vector.load %arg3[%c2, %c0_14, %c0_15] : memref<3x32x32xbf16, #tpu.memory_space<vmem>>, vector<1x32x32xbf16>
    %17 = vector.shape_cast %16 : vector<1x32x32xbf16> to vector<32x32xbf16>
    %cst_16 = arith.constant dense<0.000000e+00> : vector<8x32xf32>
    %18 = tpu.matmul %1, %17, %cst_16 {dimension_numbers = #tpu.dot_dimension_numbers<[1], [0], [0], [1], [0, 0, 1, 1], [], []>} : vector<8x32xbf16>, vector<32x32xbf16>, vector<8x32xf32> -> vector<8x32xf32>
    %19 = arith.truncf %18 : vector<8x32xf32> to vector<8x32xbf16>
    %c0_17 = arith.constant 0 : index
    %c0_18 = arith.constant 0 : index
    %c0_19 = arith.constant 0 : index
    %20 = vector.load %arg6[%c0_17, %c0_18, %c0_19] : memref<1x8x32xbf16, #tpu.memory_space<vmem>>, vector<1x8x32xbf16>
    %21 = vector.shape_cast %20 : vector<1x8x32xbf16> to vector<8x32xbf16>
    %22 = vector.shape_cast %19 : vector<8x32xbf16> to vector<1x8x32xbf16>
    tpu.vector_store %arg6[%c0_17, %c0_18, %c0_19], %22 {strides = array<i32>} : memref<1x8x32xbf16, #tpu.memory_space<vmem>>, vector<1x8x32xbf16>,
    return
  }
  func.func @transform_0(%arg0: i32, %arg1: i32) -> (i32, i32, i32) {
    %c0_i32 = arith.constant 0 : i32
    %c0_i32_0 = arith.constant 0 : i32
    return %arg0, %arg1, %c0_i32 : i32, i32, i32
  }
  func.func @transform_1(%arg0: i32, %arg1: i32) -> (i32, i32, i32) {
    %c0_i32 = arith.constant 0 : i32
    %c0_i32_0 = arith.constant 0 : i32
    %c0_i32_1 = arith.constant 0 : i32
    %c0_i32_2 = arith.constant 0 : i32
    return %c0_i32, %c0_i32_0, %c0_i32_1 : i32, i32, i32
  }
  func.func @transform_2(%arg0: i32, %arg1: i32) -> (i32, i32, i32) {
    %c0_i32 = arith.constant 0 : i32
    %c0_i32_0 = arith.constant 0 : i32
    return %arg0, %arg1, %c0_i32 : i32, i32, i32
  }
  func.func @transform_3(%arg0: i32, %arg1: i32) -> (i32, i32, i32) {
    %c0_i32 = arith.constant 0 : i32
    %c0_i32_0 = arith.constant 0 : i32
    return %arg0, %arg1, %c0_i32 : i32, i32, i32
  }
  func.func @transform_4(%arg0: i32, %arg1: i32) -> (i32, i32, i32) {
    %c0_i32 = arith.constant 0 : i32
    %c0_i32_0 = arith.constant 0 : i32
    return %arg0, %arg1, %c0_i32 : i32, i32, i32
  }
}

</mosaic_0001>

<bundles_post_ra>
// kernel: tpu_custom_call.1
= control target key start
LH: loop header
LB: loop body
LE: loop exit
PB: predicated region body
PF: predicated region fallthrough
CT: control target
= control target key end

     0   :  { %10 = vsyncpa [#allocation3], 0  ;;  %s1357_s0 = inlined_call_operand.hbm [shape: bf16[2,8,32], index: 0, kind: input, shape index: {}]   ;;  %s1358_s1 = inlined_call_operand.hbm [shape: bf16[3,32,32], index: 1, kind: input, shape index: {}]   ;;  %s1359_s2 = inlined_call_operand.hbm [shape: bf16[2,8,32], index: 2, kind: output, shape index: {0}]   ;;  %s1360_s3 = inlined_call_operand.hbm [shape: bf16[2,8,32], index: 3, kind: output, shape index: {1}]   ;;  %s1361_s4 = inlined_call_operand.hbm [shape: bf16[2,8,32], index: 4, kind: output, shape index: {2}]  }
   0x1   :  { %12 = vsyncpa [#allocation3 + $0x1], 0 }
   0x2   :  { %13 = vsyncpa [#allocation6], 0 }
   0x3   :  { %14 = vsyncpa [#allocation4], 0 }
   0x4   :  { %16 = vsyncpa [#allocation4 + $0x1], 0 }
   0x5   :  { %17 = vsyncpa [#allocation9], 0 }
   0x6   :  { %19 = vsyncpa [#allocation9 + $0x1], 0  ;;  %s1052_s15 = smov 0   ;;  %s1054_s16 = smov 0  }
   0x7   :  { %s1056_s17 = smov 0   ;;  %s1058_s18 = smov 0  }
   0x8   :  { %s1060_s19 = smov 0   ;;  %s1062_s20 = smov 0  }
   0x9 LB: > { %s1083_s21 = sadd.s32 4294967295, %s1016_s20   ;;  %s1365_s22 = sadd.s32 4294967294, %s1016_s20   ;;  %s1016_s20 = sphi %s1062_s20, %s25_s20   ;;  %s1012_s19 = sphi %s1060_s19, %s1386_s19   ;;  %s1008_s18 = sphi %s1058_s18, %s1385_s18   ;;  %s1004_s17 = sphi %s1056_s17, %s1384_s17   ;;  %s1000_s16 = sphi %s1054_s16, %s1383_s16   ;;  %s996_s15 = sphi %s1052_s15, %s1382_s15  }
   0xa   : > { %p59_p0 = scmp.ne.s32.totalorder %s1000_s16, %s996_s15  ;;  %p1362_p1 = scmp.eq.s32.totalorder %s1083_s21, 0 }
   0xb   : > { %p112_p3 = scmp.eq.s32.totalorder %s1365_s22, 1  ;;  %p658_p5 = scmp.ge.s32.totalorder %s1016_s20, 1 }
   0xc   : > { %p1094_p4 = por %p1362_p1, %p59_p0  ;;  %p175_p7 = scmp.lt.s32.totalorder %s1016_s20, 3 }
   0xd   : > { %p1099_p6 = por %p112_p3, %p59_p0  ;;  %s1018_s26 = smov [#allocation5]  }
   0xe   : > { %s1366_s23 = scalar_select %p1094_p4, 1, 0 }
   0xf   : > { %s1367_s24 = scalar_select %p1099_p6, 1, 0 }
  0x10   : > { %p1104_p8 = pnand %p658_p5, %p175_p7  ;;  %s187_s27 = sshll.u32 %s1018_s26, 4  ;;  %s188_s27 = int_to_ptr.vmem [resolvable:$true] %s187_s27 }
  0x11   : > { %s37_s29 = sadd.s32 1, %s1012_s19  ;;  %s812_s6 = scalar_lea.hbm %s1358_s1, 768 }
  0x12   : > { %s1368_s25 = scalar_select %p1104_p8, 1, 0 }
  0x13   : > { %p731_p9 = pneg %p1104_p8  ;;  %p813_p12 = scmp.ne.s32.totalorder %s1358_s1, %s812_s6 }
  0x14   : > { %p819_p5 = scmp.lt.u32.totalorder %s812_s6, %s1358_s1 }
  0x15   : > { %p1113_p11 = pnand %p731_p9, %p1362_p1 }
  0x17   : > { %p814_p13 = pneg %p1113_p11 }
  0x19   : > { %p815_p0 = pnand %p814_p13, %p813_p12 }
  0x1b   : > { %p816_p3 = pneg %p815_p0 }
  0x1d   : > { %p821_p7 = pnand %p819_p5, %p816_p3 }
  0x1f   : > { %824 = shalt.err (!%p821_p7)
}
  0x20   : > { %s825_s11 = scalar_lea.vmem %s188_s27, 768  ;;  %p833_p2 = scmp.lt.s32.totalorder %s188_s27, %s188_s27 }
  0x21   : > { %p826_p9 = scmp.ne.s32.totalorder %s188_s27, %s825_s11  ;;  %p834_p6 = scmp.lt.s32.totalorder %s825_s11, %s825_s11 }
  0x23   : > { %p828_p10 = pnand %p826_p9, %p814_p13  ;;  %p835_p4 = por %p834_p6, %p833_p2 }
  0x25   : > { %p829_p1 = pneg %p828_p10 }
  0x27   : > { %p836_p8 = pnand %p835_p4, %p829_p1 }
  0x29   : > { %839 = shalt.err (!%p836_p8)
}
  0x2a   : > { %s1019_s12 = smov 64   ;;  %s1020_s13 = smov 4  }
  0x2b   : > { %734 = dma.hbm_to_vmem [thread:$0]  (!%p1113_p11), %s1358_s1, 768, %s188_s27, [#allocation6], %s1019_s12, %s1019_s12, %s1020_s13  }
  0x2c   : > { %p39_p1 = scmp.ge.s32.totalorder %s37_s29, 2  ;;  %s46_s30 = sadd.s32 1, %s1004_s17 }
  0x2d   : > { %p53_p2 = scmp.ne.s32.totalorder %s1004_s17, %s1000_s16  ;;  %p54_p4 = scmp.eq.s32.totalorder %s1016_s20, 0 }
  0x2e   : > { %s1388_s29 = smov (%p39_p1, %s37_s29), 0  ;;  %p1371_p8 = scmp.eq.s32.totalorder %s1083_s21, 1 }
  0x2f   : > { %p1140_p6 = por %p54_p4, %p53_p2  ;;  %s41_s28 = ssub.s32 %s1012_s19, %s1388_s29 }
  0x30   : > { %p1146_p10 = por %p1371_p8, %p53_p2  ;;  %p750_p12 = scmp.lt.s32.totalorder %s1016_s20, 2 }
  0x31   : > { %p44_p11 = scmp.eq.s32.totalorder %s41_s28, 0  ;;  %s201_s27 = sand.u32 1, %s1004_s17  }
  0x32   : > { %s661_s7 = sshll.u32 %s201_s27, 2  ;;  %s662_s9 = sshll.u32 %s1012_s19, 6 }
  0x33   : > { %s1155_s8 = scalar_select %p44_p11, %s1004_s17, %s46_s30  }
  0x34   : > { %s1161_s12 = scalar_lea.hbm %s1357_s0, %s662_s9  ;;  %s205_s13 = scalar_lea.vmem [#allocation2], %s661_s7 }
  0x35   : > { %s213_s14 = sshll.u32 %s205_s13, 4  ;;  %p1167_p13 = pnand %p750_p12, %p1140_p6  ;;  %s1163_s14 = int_to_ptr.vmem [resolvable:$true] %s213_s14 }
  0x36   : > { %s202_s30 = scalar_lea.sflag [#allocation3], %s201_s27  ;;  %s840_s28 = scalar_lea.hbm %s1161_s12, 64 }
  0x37   : > { %p841_p0 = scmp.ne.s32.totalorder %s1161_s12, %s840_s28  ;;  %p842_p3 = pneg %p1167_p13 }
  0x38   : > { %s845_s10 = scalar_lea.hbm %s1357_s0, 128  ;;  %p846_p9 = scmp.lt.u32.totalorder %s1161_s12, %s1357_s0 }
  0x39   : > { %p843_p5 = pnand %p842_p3, %p841_p0  ;;  %p847_p1 = scmp.lt.u32.totalorder %s845_s10, %s840_s28 }
  0x3a   : > { %p849_p4 = scmp.lt.u32.totalorder %s840_s28, %s1161_s12 }
  0x3b   : > { %p844_p7 = pneg %p843_p5  ;;  %p848_p2 = por %p847_p1, %p846_p9 }
  0x3d   : > { %p850_p6 = por %p849_p4, %p848_p2 }
  0x3f   : > { %p851_p8 = pnand %p850_p6, %p844_p7 }
  0x41   : > { %854 = shalt.err (!%p851_p8)
}
  0x42   : > { %s855_s27 = scalar_lea.vmem %s1163_s14, 64  ;;  %s1021_s13 = smov [#allocation2]  }
  0x43   : > { %p856_p12 = scmp.ne.s32.totalorder %s1163_s14, %s855_s27  ;;  %s860_s7 = sshll.u32 %s1021_s13, 4  ;;  %s861_s7 = int_to_ptr.vmem [resolvable:$false] %s860_s7 }
  0x44   : > { %s862_s9 = scalar_lea.vmem %s861_s7, 128  ;;  %p863_p5 = scmp.lt.s32.totalorder %s1163_s14, %s861_s7 }
  0x45   : > { %p858_p11 = pnand %p856_p12, %p842_p3  ;;  %p864_p9 = scmp.lt.s32.totalorder %s862_s9, %s855_s27 }
  0x47   : > { %p859_p0 = pneg %p858_p11  ;;  %p865_p1 = por %p864_p9, %p863_p5 }
  0x49   : > { %p866_p2 = pnand %p865_p1, %p859_p0 }
  0x4b   : > { %869 = shalt.err (!%p866_p2)
}
  0x4c   : > { %738 = dma.hbm_to_vmem [thread:$0]  (!%p1167_p13), %s1161_s12, 64, %s1163_s14, %s202_s30  }
  0x4d   : > { %p1374_p7 = scmp.ne.s32.totalorder %s1368_s25, 0 }
  0x4e   : > { %s1199_s28 = sand.u32 (!%p1374_p7), 1, %s1000_s16   ;;  %p1375_p3 = scmp.ne.s32.totalorder (!%p1374_p7), %s1366_s23, 0 }
  0x4f   : > { %222 = sbr.rel (%p1374_p7) target bundleno = 375 (0x177), region = 28  ;;  %s1202_s10 = sshll.u32 (!%p1374_p7), %s1199_s28, 2 }
  0x50   : > { %s225_s5 = scalar_lea.sflag (!%p1374_p7), [#allocation3], %s1199_s28  ;;  %s228_s11 = scalar_lea.vmem (!%p1374_p7), [#allocation2], %s1202_s10 }
  0x56   : > { %979 = dma.done.wait (%p1375_p3), %s225_s5, 64  }
  0x57   : > { %981 = vsyncadd (%p1375_p3), %s225_s5, 4294967232  ;;  %p1376_p13 = scmp.eq.s32.totalorder %s1083_s21, 0 }
  0x59   : > { %983 = dma.done.wait (%p1376_p13), [#allocation6], 768   ;;  %p1377_p4 = pmov %p1376_p13 }
  0x5a   : > { %v1022_v0 = vmov 0.0   ;;  %vm1023_vm0 = vmmov 0   ;;  %v806_v1 = vld [vmem:[#allocation5] sm:$0xff]   ;;  %v807_v2 = vld [vmem:[#allocation5 + $0x8] sm:$0xff]   ;;  %v808_v3 = vld [vmem:[#allocation5 + $0x10] sm:$0xff]   ;;  %vm285_vm1 = vcmask 261120  }
  0x5b   : > { %985 = vsyncadd (%p1377_p4), [#allocation6], 4294966528  ;;  %695 = vmatprep.subr.bf16.mxu0 %v1022_v0  ;;  %703 = vmatprep.subr.bf16.mxu1 %v1022_v0  ;;  %v810_v4 = vld [vmem:[#allocation5 + $0x18] sm:$0xff]   ;;  %v809_v6 = vld [vmem:[#allocation5 + $0x20] sm:$0xff]   ;;  %s1218_s23 = sshll.u32 %s1008_s18, 6  ;;  %s252_s25 = scalar_lea.vmem [#allocation7], %s1202_s10 }
  0x5c   : > { %699 = vmatprep.mubr.msk.bf16.mxu0 %vm1023_vm0, %v1022_v0  ;;  %707 = vmatprep.mubr.msk.bf16.mxu1 %vm1023_vm0, %v1022_v0  ;;  %v268_v5 = vld [vmem:[%s228_s11] sm:$0xf]  ;;  %v811_v7 = vld [vmem:[#allocation5 + $0x28] sm:$0xff]   ;;  %s475_s12 = sshll.u32 %s252_s25, 4  ;;  %vm330_vm2 = vcmask 257024   ;;  %s259_s26 = scalar_lea.vmem [#allocation8], %s1202_s10  ;;  %s1231_s12 = int_to_ptr.vmem [resolvable:$true] %s475_s12 }
  0x5d   : > { %696 = vmatpush3.bf16.msra.mxu0 %v806_v1  ;;  %704 = vmatpush3.bf16.msra.mxu1 %v808_v3  ;;  %s489_s30 = sshll.u32 %s259_s26, 4  ;;  %s1229_s7 = scalar_lea.hbm %s1359_s2, %s1218_s23  ;;  %s1239_s30 = int_to_ptr.vmem [resolvable:$true] %s489_s30 }
  0x5e   : > { %697 = vmatprep.subr.bf16.mxu0 %v1022_v0  ;;  %705 = vmatprep.subr.bf16.mxu1 %v1022_v0  ;;  %s1237_s5 = scalar_lea.hbm %s1360_s3, %s1218_s23  ;;  %s451_s11 = scalar_lea.sflag [#allocation4], %s1199_s28 }
  0x5f   : > { %s870_s27 = scalar_lea.vmem %s1231_s12, 64  ;;  %s1024_s13 = smov [#allocation7]  }
  0x60   : > { %p871_p6 = scmp.ne.s32.totalorder %s1231_s12, %s870_s27  ;;  %s874_s22 = sshll.u32 %s1024_s13, 4  ;;  %s875_s22 = int_to_ptr.vmem [resolvable:$false] %s874_s22 }
  0x61   : > { %698 = vmatpush3.bf16.msra.mxu0 %v807_v2  ;;  %706 = vmatpush3.bf16.msra.mxu1 %v810_v4  ;;  %s876_s14 = scalar_lea.vmem %s875_s22, 128  ;;  %p877_p11 = scmp.lt.s32.totalorder %s1231_s12, %s875_s22 }
  0x62   : > { %711 = vmatprep.subr.bf16.mxu0 %v1022_v0  ;;  %p872_p8 = pnand %p871_p6, %p1146_p10  ;;  %p878_p0 = scmp.lt.s32.totalorder %s876_s14, %s870_s27 }
  0x64   : > { %700 = vmatmul.mubr.msk.bf16.vlgmr.msra.gmra.mrb[0].mxu0 %vm285_vm1, %v268_v5  ;;  %708 = vmatmul.mubr.msk.bf16.vlgmr.msra.gmra.mrb[0].mxu1 %vm285_vm1, %v268_v5  ;;  %p873_p12 = pneg %p872_p8  ;;  %p879_p5 = por %p878_p0, %p877_p11 }
  0x65   : > { %712 = vmatpush3.bf16.msra.mxu0 %v809_v6  ;;  %715 = vmatprep.mubr.msk.bf16.mxu0 %vm1023_vm0, %v1022_v0 }
  0x66   : > { %713 = vmatprep.subr.bf16.mxu0 %v1022_v0  ;;  %p880_p9 = pnand %p879_p5, %p873_p12 }
  0x69   : > { %714 = vmatpush3.bf16.msra.mxu0 %v811_v7 }
  0x6c   : > { %716 = vmatmul.mubr.msk.bf16.vlgmr.msra.gmra.mrb[4].mxu0 %vm285_vm1, %v268_v5 }
 0x137   : > { %v323_v8 = vpop.f32.mrb[0].mxu0  ;;  %v383_v12 = vpop.f32.mrb[0].mxu1 }
 0x138   : > { %v329_v9 = vpack.c.bf16 %v323_v8, %v323_v8  ;;  %v701_v10 = vpop.f32.mrb[1].mxu0  ;;  %v389_v14 = vpack.c.bf16 %v383_v12, %v383_v12  ;;  %v709_v15 = vpop.f32.mrb[1].mxu1 }
 0x139   : > { %v326_v11 = vpop.f32.mrb[2].mxu0  ;;  %v386_v16 = vpop.f32.mrb[2].mxu1 }
 0x13a   : > { %v702_v13 = vpop.f32.mrb[3].mxu0  ;;  %331 = vst.msk [vmem:[%s252_s25] sm:$0xf] %vm330_vm2, %v329_v9 }
 0x13b   : > { %883 = shalt.err (!%p880_p9)
}
 0x13c   : > { %s884_s28 = scalar_lea.hbm %s1229_s7, 64  ;;  %s888_s9 = scalar_lea.hbm %s1359_s2, 128 }
 0x13d   : > { %p885_p1 = scmp.ne.s32.totalorder %s1229_s7, %s884_s28  ;;  %p889_p3 = scmp.lt.u32.totalorder %s1229_s7, %s1359_s2 }
 0x13e   : > { %p890_p13 = scmp.lt.u32.totalorder %s888_s9, %s884_s28  ;;  %p892_p6 = scmp.lt.u32.totalorder %s884_s28, %s1229_s7 }
 0x13f   : > { %p886_p2 = pnand %p885_p1, %p1146_p10 }
 0x140   : > { %p891_p4 = por %p890_p13, %p889_p3 }
 0x141   : > { %p887_p7 = pneg %p886_p2 }
 0x142   : > { %p893_p8 = por %p892_p6, %p891_p4 }
 0x144   : > { %p894_p12 = pnand %p893_p8, %p887_p7 }
 0x146   : > { %897 = shalt.err (!%p894_p12)
}
 0x147   : > { %725 = dma.vmem_to_hbm [thread:$0]  (%p1146_p10), %s1231_s12, 64, %s1229_s7, %s451_s11   ;;  %v710_v17 = vpop.f32.mrb[3].mxu1  ;;  %390 = vst.msk [vmem:[%s259_s26] sm:$0xf] %vm330_vm2, %v389_v14 }
 0x148   : > { %s266_s14 = scalar_lea.vmem [#allocation10], %s1202_s10  ;;  %s1378_s28 = sand.u32 1, %s1083_s21  }
 0x149   : > { %s1270_s27 = sshll.u32 %s266_s14, 4  ;;  %s1274_s25 = scalar_lea.sflag [#allocation9], %s1378_s28  ;;  %s1305_s27 = int_to_ptr.vmem [resolvable:$true] %s1270_s27 }
 0x14a   : > { %s898_s18 = scalar_lea.vmem %s1239_s30, 64  ;;  %s1025_s9 = smov [#allocation8]  }
 0x14b   : > { %p899_p11 = scmp.ne.s32.totalorder %s1239_s30, %s898_s18  ;;  %s902_s13 = sshll.u32 %s1025_s9, 4  ;;  %s903_s13 = int_to_ptr.vmem [resolvable:$false] %s902_s13 }
 0x14c   : > { %s904_s12 = scalar_lea.vmem %s903_s13, 128  ;;  %p905_p9 = scmp.lt.s32.totalorder %s1239_s30, %s903_s13 }
 0x14d   : > { %p900_p0 = pnand %p899_p11, %p1146_p10  ;;  %p906_p1 = scmp.lt.s32.totalorder %s904_s12, %s898_s18 }
 0x14f   : > { %p901_p5 = pneg %p900_p0  ;;  %p907_p2 = por %p906_p1, %p905_p9 }
 0x151   : > { %p908_p7 = pnand %p907_p2, %p901_p5 }
 0x153   : > { %911 = shalt.err (!%p908_p7)
}
 0x154   : > { %s912_s21 = scalar_lea.hbm %s1237_s5, 64  ;;  %s916_s11 = scalar_lea.hbm %s1360_s3, 128 }
 0x155   : > { %p913_p3 = scmp.ne.s32.totalorder %s1237_s5, %s912_s21  ;;  %p917_p6 = scmp.lt.u32.totalorder %s1237_s5, %s1360_s3 }
 0x156   : > { %p918_p8 = scmp.lt.u32.totalorder %s916_s11, %s912_s21  ;;  %p920_p11 = scmp.lt.u32.totalorder %s912_s21, %s1237_s5 }
 0x157   : > { %p914_p13 = pnand %p913_p3, %p1146_p10 }
 0x158   : > { %p919_p12 = por %p918_p8, %p917_p6 }
 0x159   : > { %p915_p4 = pneg %p914_p13 }
 0x15a   : > { %p921_p0 = por %p920_p11, %p919_p12 }
 0x15c   : > { %p922_p5 = pnand %p921_p0, %p915_p4 }
 0x15e   : > { %925 = shalt.err (!%p922_p5)
}
 0x15f   : > { %726 = dma.vmem_to_hbm [thread:$0]  (%p1146_p10), %s1239_s30, 64, %s1237_s5, %s1274_s25   ;;  %v442_v18 = vpop.f32.mrb[4].mxu0 }
 0x160   : > { %v448_v19 = vpack.c.bf16 %v442_v18, %v442_v18  ;;  %v717_v20 = vpop.f32.mrb[5].mxu0  ;;  %s1302_s13 = scalar_lea.hbm %s1361_s4, %s1218_s23  ;;  %s926_s12 = scalar_lea.vmem %s1305_s27, 64 }
 0x161   : > { %v445_v21 = vpop.f32.mrb[6].mxu0  ;;  %p927_p9 = scmp.ne.s32.totalorder %s1305_s27, %s926_s12  ;;  %s1026_s30 = smov [#allocation10]  }
 0x162   : > { %v718_v22 = vpop.f32.mrb[7].mxu0  ;;  %449 = vst.msk [vmem:[%s266_s14] sm:$0xf] %vm330_vm2, %v448_v19  ;;  %s930_s5 = sshll.u32 %s1026_s30, 4  ;;  %s931_s5 = int_to_ptr.vmem [resolvable:$false] %s930_s5 }
 0x163   : > { %p928_p1 = pnand %p927_p9, %p1146_p10  ;;  %s932_s23 = scalar_lea.vmem %s931_s5, 128 }
 0x164   : > { %p933_p7 = scmp.lt.s32.totalorder %s1305_s27, %s931_s5  ;;  %p934_p3 = scmp.lt.s32.totalorder %s932_s23, %s926_s12 }
 0x165   : > { %p929_p2 = pneg %p928_p1 }
 0x166   : > { %p935_p13 = por %p934_p3, %p933_p7 }
 0x168   : > { %p936_p4 = pnand %p935_p13, %p929_p2 }
 0x16a   : > { %939 = shalt.err (!%p936_p4)
}
 0x16b   : > { %s940_s10 = scalar_lea.hbm %s1302_s13, 64  ;;  %s944_s26 = scalar_lea.hbm %s1361_s4, 128 }
 0x16c   : > { %p941_p6 = scmp.ne.s32.totalorder %s1302_s13, %s940_s10  ;;  %p945_p11 = scmp.lt.u32.totalorder %s1302_s13, %s1361_s4 }
 0x16d   : > { %p946_p0 = scmp.lt.u32.totalorder %s944_s26, %s940_s10  ;;  %p948_p9 = scmp.lt.u32.totalorder %s940_s10, %s1302_s13 }
 0x16e   : > { %p942_p8 = pnand %p941_p6, %p1146_p10 }
 0x16f   : > { %p947_p5 = por %p946_p0, %p945_p11 }
 0x170   : > { %p943_p12 = pneg %p942_p8 }
 0x171   : > { %p949_p1 = por %p948_p9, %p947_p5 }
 0x173   : > { %p950_p2 = pnand %p949_p1, %p943_p12 }
 0x175   : > { %953 = shalt.err (!%p950_p2)
}
 0x176   : > { %727 = dma.vmem_to_hbm [thread:$0]  (%p1146_p10), %s1305_s27, 64, %s1302_s13, %s1274_s25  }
 0x177 PF: > { %s515_s22 = sand.u32 1, %s996_s15   ;;  %p1379_p7 = scmp.ne.s32.totalorder %s1367_s24, 0 }
 0x178   : > { %p1380_p3 = scmp.ge.s32.totalorder %s1016_s20, 2  ;;  %s516_s28 = scalar_lea.sflag [#allocation4], %s515_s22 }
 0x17a   : > { %p740_p13 = pnand %p1380_p3, %p1379_p7 }
 0x17c   : > { %987 = dma.done.wait (!%p740_p13), %s516_s28, 64  }
 0x17d   : > { %989 = vsyncadd (!%p740_p13), %s516_s28, 4294967232  ;;  %s1381_s18 = sadd.s32 4294967294, %s1016_s20  }
 0x17e   : > { %s524_s9 = sand.u32 1, %s1381_s18  }
 0x17f   : > { %s525_s12 = scalar_lea.sflag [#allocation9], %s524_s9 }
 0x180   : > { %991 = dma.done.wait (!%p740_p13), %s525_s12, 128  }
 0x181   : > { %993 = vsyncadd (!%p740_p13), %s525_s12, 4294967168  ;;  %s25_s20 = sadd.s32 1, %s1016_s20   ;;  %s1382_s15 = smov %s1000_s16 }
 0x182   : > { %p22_p10 = scmp.ge.s32.totalorder %s25_s20, 4   ;;  %s1383_s16 = smov %s1004_s17 }
 0x183   : > { %s1384_s17 = smov %s1155_s8  ;;  %s1385_s18 = smov %s1012_s19 }
 0x184   : > { %s1386_s19 = smov %s1388_s29  ;;  %24 = sbr.rel (!%p22_p10) target bundleno = 9 (0x9), region = 111 }
 0x18b   :  { %539 = vsyncpa [#allocation3], 1 }
 0x18c   :  { %541 = vsyncpa [#allocation3 + $0x1], 1 }
 0x18d   :  { %542 = vsyncpa [#allocation6], 1 }
 0x18e   :  { %543 = vsyncpa [#allocation4], 1 }
 0x18f   :  { %545 = vsyncpa [#allocation4 + $0x1], 1 }
 0x190   :  { %546 = vsyncpa [#allocation9], 1 }
 0x191   :  { %548 = vsyncpa [#allocation9 + $0x1], 1 }

</bundles_post_ra>
